<compile_context>
chip_gen: v6e
topology: v6e:2x2x1
jax: 0.10.0
libtpu: 0.0.40
codegen_flags: <defaults>
</compile_context>

<pallas_src>
import functools

import jax
import jax.numpy as jnp
from jax.experimental import pallas as pl
from jax.experimental.pallas import tpu as pltpu


def _round_up(v, m):
    return (v + m - 1) // m * m


# ----------------------------------------------------------------------------
# Kernel 1: fused node transform  [x_l | x_r] = x @ [W_l | W_r] + [b_l | b_r]
# ----------------------------------------------------------------------------
def _dual_linear_kernel(x_ref, w_ref, b_ref, o_ref):
    o_ref[...] = (jnp.dot(x_ref[...], w_ref[...],
                          preferred_element_type=jnp.float32)
                  + b_ref[...]).astype(o_ref.dtype)


def _dual_linear(x_p, w, b, *, node_tile):
    n_pad, k = x_p.shape
    wout = w.shape[1]
    return pl.pallas_call(
        _dual_linear_kernel,
        out_shape=jax.ShapeDtypeStruct((n_pad, wout), jnp.float32),
        grid_spec=pltpu.PrefetchScalarGridSpec(
            num_scalar_prefetch=0,
            grid=(n_pad // node_tile,),
            in_specs=[pl.BlockSpec((node_tile, k), lambda i: (i, 0)),
                      pl.BlockSpec((k, wout), lambda i: (0, 0)),
                      pl.BlockSpec((1, wout), lambda i: (0, 0))],
            out_specs=pl.BlockSpec((node_tile, wout), lambda i: (i, 0))),
        compiler_params=pltpu.CompilerParams(
            dimension_semantics=("parallel",)),
    )(x_p, w, b)


# ----------------------------------------------------------------------------
# Kernel 2: GATv2 edge aggregation (attention + segment softmax + scatter-add)
# ----------------------------------------------------------------------------
def _gatv2_edge_kernel(src_sm, dst_sm,
                       xlr_ref, attm_ref, expand_ref, bias_ref, dstv_ref,
                       o_ref,
                       acc_ref, m_ref, gl_ref, gr_ref,
                       *, heads, out_ch, e_real, e_tile, relu):
    H = heads
    HC = heads * out_ch
    Et = e_tile
    Nt = o_ref.shape[0]
    ident_expand = (out_ch == 1)      # per-head -> per-column expansion is identity

    nblk = pl.program_id(0)           # node-block axis ("parallel")
    eblk = pl.program_id(1)           # edge-block axis ("arbitrary", accumulated)

    @pl.when(eblk == 0)
    def _init():
        acc_ref[...] = jnp.zeros(acc_ref.shape, acc_ref.dtype)
        m_ref[...] = jnp.full(m_ref.shape, -1e30, m_ref.dtype)

    e_base = eblk * Et

    # ---- index-driven row gather (indices live in SMEM via scalar prefetch) ----
    def _gather(e, carry):
        j = src_sm[e_base + e]
        d = dst_sm[e_base + e]
        gl_ref[pl.ds(e, 1), :] = xlr_ref[pl.ds(j, 1), 0:HC]        # x_l[src]
        gr_ref[pl.ds(e, 1), :] = xlr_ref[pl.ds(d, 1), HC:2 * HC]   # x_r[dst]
        return carry
    jax.lax.fori_loop(0, Et, _gather, 0)
    # TODO(synk): for node tables too large for VMEM, switch this loop to a
    # manual pltpu.make_async_copy DMA gather from HBM (memory_space=pl.ANY).

    gl = gl_ref[...]                                   # (Et, HC)
    gr = gr_ref[...]                                   # (Et, HC)

    # GATv2 attention logits: alpha[e, h] = att_h . leaky_relu(x_l[j] + x_r[i])_h
    s = gl + gr
    s = jnp.where(s > 0, s, 0.2 * s)                   # LeakyReLU(0.2)
    if H == 1 and out_ch == 1:
        alpha = s * attm_ref[...]                      # (Et, 1)
    else:
        alpha = jnp.dot(s, attm_ref[...],
                        preferred_element_type=jnp.float32)       # (Et, H)

    # mask padded edges
    eids = e_base + jax.lax.broadcasted_iota(jnp.int32, (Et, H), 0)
    valid = eids < e_real
    alpha = jnp.where(valid, alpha, -1e30)

    # online softmax with a per-head running max (a constant shift per segment)
    m_old = m_ref[...]                                 # (1, H)
    m_new = jnp.maximum(m_old, jnp.max(alpha, axis=0, keepdims=True))
    m_ref[...] = m_new
    r = jnp.exp(m_old - m_new)                         # (1, H) rescale factor
    p = jnp.where(valid, jnp.exp(alpha - m_new), 0.0)  # (Et, H)

    if ident_expand:
        p_full = p
        r_num = r
    else:
        p_full = jnp.dot(p, expand_ref[...],
                         preferred_element_type=jnp.float32)      # (Et, HC)
        r_num = jnp.dot(r, expand_ref[...],
                        preferred_element_type=jnp.float32)       # (1, HC)

    msg = gl * p_full                                  # weighted messages (Et, HC)
    payload = jnp.concatenate([msg, p], axis=1)        # (Et, HC+H): denom fused in
    r_row = jnp.concatenate([r_num, r], axis=1)        # (1, HC+H)

    # scatter-add via a *bounded* (Nt, Et) one-hot MXU matmul
    node_ids = nblk * Nt + jax.lax.broadcasted_iota(jnp.int32, (Nt, Et), 0)
    scat = (dstv_ref[...] == node_ids).astype(jnp.float32)        # (Nt, Et)
    acc_ref[...] = acc_ref[...] * r_row + jnp.dot(
        scat, payload, preferred_element_type=jnp.float32)

    @pl.when(eblk == pl.num_programs(1) - 1)
    def _finalize():
        num = acc_ref[:, :HC]                          # (Nt, HC)
        den = acc_ref[:, HC:]                          # (Nt, H)
        # exact reciprocal to keep the 1e-4 check tight (approx=True is a flag flip)
        inv = pl.reciprocal(jnp.maximum(den, 1e-30), approx=False)
        if ident_expand:
            inv_full = inv
        else:
            inv_full = jnp.dot(inv, expand_ref[...],
                               preferred_element_type=jnp.float32)
        out = num * inv_full + bias_ref[...]
        if relu:                                       # fused F.relu after gat1
            out = jnp.maximum(out, 0.0)
        o_ref[...] = out.astype(o_ref.dtype)


def _edge_aggregate(xlr, attm, expand, bias, src_p, dst_p, *, heads, out_ch,
                    e_real, node_tile, edge_tile, relu):
    n_pad, wpad = xlr.shape
    HC = heads * out_ch
    e_pad = src_p.shape[0]
    grid = (n_pad // node_tile, e_pad // edge_tile)
    dst_v = dst_p.reshape(1, e_pad)
    kernel = functools.partial(_gatv2_edge_kernel, heads=heads, out_ch=out_ch,
                               e_real=e_real, e_tile=edge_tile, relu=relu)
    return pl.pallas_call(
        kernel,
        out_shape=jax.ShapeDtypeStruct((n_pad, HC), jnp.float32),
        grid_spec=pltpu.PrefetchScalarGridSpec(
            num_scalar_prefetch=2,                     # src, dst -> SMEM
            grid=grid,
            in_specs=[
                pl.BlockSpec((n_pad, wpad), lambda i, b, s, d: (0, 0)),
                pl.BlockSpec((HC, heads), lambda i, b, s, d: (0, 0)),
                pl.BlockSpec((heads, HC), lambda i, b, s, d: (0, 0)),
                pl.BlockSpec((1, HC), lambda i, b, s, d: (0, 0)),
                pl.BlockSpec((1, edge_tile), lambda i, b, s, d: (0, b)),
            ],
            out_specs=pl.BlockSpec((node_tile, HC), lambda i, b, s, d: (i, 0)),
            scratch_shapes=[
                pltpu.VMEM((node_tile, HC + heads), jnp.float32),  # num|den acc
                pltpu.VMEM((1, heads), jnp.float32),               # running max
                pltpu.VMEM((edge_tile, HC), jnp.float32),          # gathered x_l
                pltpu.VMEM((edge_tile, HC), jnp.float32),          # gathered x_r
            ]),
        compiler_params=pltpu.CompilerParams(
            dimension_semantics=("parallel", "arbitrary")),
    )(src_p, dst_p, xlr, attm, expand, bias, dst_v)


# ----------------------------------------------------------------------------
# One GATv2Conv layer + full model forward
# ----------------------------------------------------------------------------
def gatv2_layer(x_p, src_p, dst_p, p, *, heads, out_ch, e_real,
                node_tile, edge_tile, relu):
    HC = heads * out_ch
    # [x_l | x_r] in one lane-dense matmul; width padded to a multiple of 128.
    wcat = jnp.concatenate([p["Wl"], p["Wr"]], axis=1)            # (Fin, 2*HC)
    bcat = jnp.concatenate([p["bl"], p["br"]])[None, :]           # (1, 2*HC)
    wpad = _round_up(2 * HC, 128)
    wcat = jnp.pad(wcat, ((0, 0), (0, wpad - 2 * HC)))
    bcat = jnp.pad(bcat, ((0, 0), (0, wpad - 2 * HC)))
    xlr = _dual_linear(x_p, wcat, bcat, node_tile=node_tile)      # (n_pad, wpad)

    # per-head broadcast helpers (keeps the edge kernel free of 3-D reshapes)
    expand = jnp.repeat(jnp.eye(heads, dtype=jnp.float32), out_ch, axis=1)  # (H, HC)
    attm = expand.T * p["att"].reshape(-1)[:, None]               # (HC, H)
    bias = p["bias"].reshape(1, HC)

    return _edge_aggregate(xlr, attm, expand, bias, src_p, dst_p,
                           heads=heads, out_ch=out_ch, e_real=e_real,
                           node_tile=node_tile, edge_tile=edge_tile, relu=relu)


def gat_forward(params, x, edge_index, *, heads, dim_h,
                node_tile=128, edge_tile=128):
    """Eval-mode forward of the torch GAT module."""
    N = x.shape[0]
    # GATv2Conv(add_self_loops=True): append one self loop per node.
    loops = jnp.arange(N, dtype=jnp.int32)
    src = jnp.concatenate([edge_index[0].astype(jnp.int32), loops])
    dst = jnp.concatenate([edge_index[1].astype(jnp.int32), loops])
    e_real = int(src.shape[0])
    e_pad = _round_up(e_real, edge_tile)
    src_p = jnp.pad(src, (0, e_pad - e_real))
    dst_p = jnp.pad(dst, (0, e_pad - e_real))

    n_pad = _round_up(N, node_tile)
    x_p = jnp.pad(x, ((0, n_pad - N), (0, 0)))

    # NOTE: the first F.dropout(x) in the torch forward is dead code (its result
    # is discarded); the second F.dropout is the identity in eval mode.
    # TODO(synk): training-mode dropout could be added with pltpu.prng_* if needed.
    h = gatv2_layer(x_p, src_p, dst_p, params["gat1"], heads=heads, out_ch=dim_h,
                    e_real=e_real, node_tile=node_tile, edge_tile=edge_tile,
                    relu=True)                          # fuses F.relu(gat1(x))
    out = gatv2_layer(h, src_p, dst_p, params["gat3"], heads=1, out_ch=1,
                      e_real=e_real, node_tile=node_tile, edge_tile=edge_tile,
                      relu=False)
    return out[:N]


# ----------------------------------------------------------------------------
# Parameters (glorot weights, small random biases; same params fed to reference)
# ----------------------------------------------------------------------------
def init_gat_params(key, dim_in, dim_h, heads):
    def glorot(k, shape, fi, fo):
        lim = (6.0 / (fi + fo)) ** 0.5
        return jax.random.uniform(k, shape, jnp.float32, -lim, lim)

    ks = jax.random.split(key, 12)
    HC1 = heads * dim_h
    p1 = dict(Wl=glorot(ks[0], (dim_in, HC1), dim_in, HC1),
              bl=0.1 * jax.random.normal(ks[1], (HC1,), jnp.float32),
              Wr=glorot(ks[2], (dim_in, HC1), dim_in, HC1),
              br=0.1 * jax.random.normal(ks[3], (HC1,), jnp.float32),
              att=glorot(ks[4], (heads, dim_h), dim_h, dim_h),
              bias=0.1 * jax.random.normal(ks[5], (HC1,), jnp.float32))
    p2 = dict(Wl=glorot(ks[6], (HC1, 1), HC1, 1),
              bl=0.1 * jax.random.normal(ks[7], (1,), jnp.float32),
              Wr=glorot(ks[8], (HC1, 1), HC1, 1),
              br=0.1 * jax.random.normal(ks[9], (1,), jnp.float32),
              att=glorot(ks[10], (1, 1), 1, 1),
              bias=0.1 * jax.random.normal(ks[11], (1,), jnp.float32))
    return {"gat1": p1, "gat3": p2}


# ----------------------------------------------------------------------------
# Pure-JAX reference (per-segment softmax, faithful to PyG GATv2Conv)
# ----------------------------------------------------------------------------
def _gatv2_ref(x, src, dst, p, *, heads, out_ch, relu):
    N = x.shape[0]
    H, C = heads, out_ch
    hp = jax.lax.Precision.HIGHEST
    xl = (jnp.dot(x, p["Wl"], precision=hp) + p["bl"]).reshape(N, H, C)
    xr = (jnp.dot(x, p["Wr"], precision=hp) + p["br"]).reshape(N, H, C)
    s = xl[src] + xr[dst]
    s = jnp.where(s > 0, s, 0.2 * s)
    alpha = jnp.einsum("ehc,hc->eh", s, p["att"], precision=hp)
    amax = jax.ops.segment_max(alpha, dst, num_segments=N)
    ea = jnp.exp(alpha - amax[dst])
    den = jax.ops.segment_sum(ea, dst, num_segments=N)
    num = jax.ops.segment_sum(xl[src] * ea[:, :, None], dst, num_segments=N)
    out = (num / den[:, :, None]).reshape(N, H * C) + p["bias"]
    return jnp.maximum(out, 0.0) if relu else out


def gat_ref(params, x, edge_index, *, heads, dim_h):
    N = x.shape[0]
    loops = jnp.arange(N, dtype=jnp.int32)
    src = jnp.concatenate([edge_index[0].astype(jnp.int32), loops])
    dst = jnp.concatenate([edge_index[1].astype(jnp.int32), loops])
    h = _gatv2_ref(x, src, dst, params["gat1"], heads=heads, out_ch=dim_h, relu=True)
    return _gatv2_ref(h, src, dst, params["gat3"], heads=1, out_ch=1, relu=False)


if __name__ == "__main__":
    dim_in, dim_h, heads = 16, 16, 8          # gat1: (16 -> 16, 8 heads), gat3: (128 -> 1)
    N, E_raw = 256, 500

    key = jax.random.PRNGKey(0)
    kx, ks_, ko, kp = jax.random.split(key, 4)
    x = jax.random.normal(kx, (N, dim_in), jnp.float32)
    src_raw = jax.random.randint(ks_, (E_raw,), 0, N, dtype=jnp.int32)
    offs = jax.random.randint(ko, (E_raw,), 1, N, dtype=jnp.int32)
    dst_raw = (src_raw + offs) % N            # no self loops in the raw graph
    edge_index = jnp.stack([src_raw, dst_raw])

    params = init_gat_params(kp, dim_in, dim_h, heads)

    out = gat_forward(params, x, edge_index, heads=heads, dim_h=dim_h)
    out = jax.block_until_ready(out)

    ref = gat_ref(params, x, edge_index, heads=heads, dim_h=dim_h)
    assert out.shape == (N, 1), out.shape
    assert jnp.allclose(out, ref, atol=2e-4, rtol=2e-4), \
        float(jnp.max(jnp.abs(out - ref)))
    print("KERNEL_OK")
</pallas_src>

<mosaic_0001>
module attributes {stable_mosaic.version = 11 : i64} {
  func.func @_dual_linear_kernel(%arg0: i32, %arg1: memref<128x16xf32, #tpu.memory_space<vmem>>, %arg2: memref<16x256xf32, #tpu.memory_space<vmem>>, %arg3: memref<1x256xf32, #tpu.memory_space<vmem>>, %arg4: memref<128x256xf32, #tpu.memory_space<vmem>>) attributes {dimension_semantics = [#tpu.dimension_semantics<parallel>], iteration_bounds = array<i64: 2>, scalar_prefetch = 0 : i64, scratch_operands = 0 : i64, tpu.core_type = #tpu.core_type<tc>, window_params = [{transform_indices = @transform_0, window_bounds = array<i64: 128, 16>}, {pipeline_mode = #tpu.pipeline_mode<synchronous>, transform_indices = @transform_1, window_bounds = array<i64: 16, 256>}, {pipeline_mode = #tpu.pipeline_mode<synchronous>, transform_indices = @transform_2, window_bounds = array<i64: 1, 256>}, {transform_indices = @transform_3, window_bounds = array<i64: 128, 256>}]} {
    %c0 = arith.constant 0 : index
    %c0_0 = arith.constant 0 : index
    %0 = vector.load %arg1[%c0, %c0_0] : memref<128x16xf32, #tpu.memory_space<vmem>>, vector<128x16xf32>
    %c0_1 = arith.constant 0 : index
    %c0_2 = arith.constant 0 : index
    %1 = vector.load %arg2[%c0_1, %c0_2] : memref<16x256xf32, #tpu.memory_space<vmem>>, vector<16x256xf32>
    %cst = arith.constant dense<0.000000e+00> : vector<128x256xf32>
    %2 = tpu.matmul %0, %1, %cst {dimension_numbers = #tpu.dot_dimension_numbers<[1], [0], [0], [1], [0, 0, 1, 1], [], []>} : vector<128x16xf32>, vector<16x256xf32>, vector<128x256xf32> -> vector<128x256xf32>
    %c0_3 = arith.constant 0 : index
    %c0_4 = arith.constant 0 : index
    %3 = vector.load %arg3[%c0_3, %c0_4] : memref<1x256xf32, #tpu.memory_space<vmem>>, vector<1x256xf32>
    %4 = vector.broadcast %3 : vector<1x256xf32> to vector<128x256xf32>
    %5 = arith.addf %2, %4 : vector<128x256xf32>
    %c0_5 = arith.constant 0 : index
    %c0_6 = arith.constant 0 : index
    %6 = vector.load %arg4[%c0_5, %c0_6] : memref<128x256xf32, #tpu.memory_space<vmem>>, vector<128x256xf32>
    tpu.vector_store %arg4[%c0_5, %c0_6], %5 {strides = array<i32>} : memref<128x256xf32, #tpu.memory_space<vmem>>, vector<128x256xf32>,
    return
  }
  func.func @transform_0(%arg0: i32) -> (i32, i32) {
    %c0_i32 = arith.constant 0 : i32
    %c0_i32_0 = arith.constant 0 : i32
    return %arg0, %c0_i32 : i32, i32
  }
  func.func @transform_1(%arg0: i32) -> (i32, i32) {
    %c0_i32 = arith.constant 0 : i32
    %c0_i32_0 = arith.constant 0 : i32
    %c0_i32_1 = arith.constant 0 : i32
    return %c0_i32, %c0_i32_0 : i32, i32
  }
  func.func @transform_2(%arg0: i32) -> (i32, i32) {
    %c0_i32 = arith.constant 0 : i32
    %c0_i32_0 = arith.constant 0 : i32
    %c0_i32_1 = arith.constant 0 : i32
    return %c0_i32, %c0_i32_0 : i32, i32
  }
  func.func @transform_3(%arg0: i32) -> (i32, i32) {
    %c0_i32 = arith.constant 0 : i32
    %c0_i32_0 = arith.constant 0 : i32
    return %arg0, %c0_i32 : i32, i32
  }
}

</mosaic_0001>

<bundles_post_ra>
// kernel: tpu_custom_call.1
= control target key start
LH: loop header
LB: loop body
LE: loop exit
PB: predicated region body
PF: predicated region fallthrough
CT: control target
= control target key end

     0   :  { %8 = vsyncpa [#allocation3], 0  ;;  %s911_s0 = inlined_call_operand.vmem [shape: f32[256,16], index: 0, kind: input, shape index: {}]   ;;  %s912_s1 = inlined_call_operand.vmem [shape: f32[16,256], index: 1, kind: input, shape index: {}]   ;;  %s913_s2 = inlined_call_operand.vmem [shape: f32[1,256], index: 2, kind: input, shape index: {}]   ;;  %s914_s3 = inlined_call_operand.hbm [shape: f32[256,256], index: 3, kind: output, shape index: {}]  }
   0x1   :  { %10 = vsyncpa [#allocation3 + $0x1], 0  ;;  %s686_s12 = smov 0   ;;  %s688_s13 = smov 0  }
   0x2   :  { %s690_s14 = smov 0   ;;  %s692_s15 = smov 0  }
   0x3 LB: > { %s707_s16 = sadd.s32 4294967295, %s660_s15   ;;  %s523_s17 = sadd.s32 4294967294, %s660_s15   ;;  %s660_s15 = sphi %s692_s15, %s920_s15   ;;  %s656_s14 = sphi %s690_s14, %s919_s14   ;;  %s652_s13 = sphi %s688_s13, %s918_s13   ;;  %s648_s12 = sphi %s686_s12, %s917_s12  }
   0x4   : > { %s711_s18 = sadd.s32 1, %s660_s15   ;;  %s91_s19 = sadd.s32 1, %s656_s14 }
   0x5   : > { %s88_s20 = ssub.s32 %s660_s15, %s711_s18  ;;  %p101_p0 = scmp.ne.s32.totalorder %s656_s14, %s652_s13 }
   0x6   : > { %p89_p1 = scmp.eq.s32.totalorder %s88_s20, 0  ;;  %p102_p2 = scmp.eq.s32.totalorder %s707_s16, 1 }
   0x7   : > { %p107_p3 = scmp.ne.s32.totalorder %s652_s13, %s648_s12  ;;  %p108_p4 = scmp.eq.s32.totalorder %s523_s17, 1 }
   0x8   : > { %s722_s21 = scalar_select %p89_p1, %s656_s14, %s91_s19  }
   0x9   : > { %p724_p5 = por %p102_p2, %p101_p0  ;;  %p728_p6 = por %p108_p4, %p107_p3 }
   0xa   : > { %p526_p7 = scmp.ge.s32.totalorder %s660_s15, 1  ;;  %p141_p8 = scmp.lt.s32.totalorder %s660_s15, 3 }
   0xc   : > { %p142_p9 = pnand %p526_p7, %p141_p8 }
   0xd   : > { %s528_s30 = sshll.u32 (!%p142_p9), %s707_s16, 4  ;;  %s162_s10 = sand.u32 (!%p142_p9), 1, %s652_s13  }
   0xe   : > { %145 = sbr.rel (%p142_p9) target bundleno = 264 (0x108), region = 32  ;;  %p166_p10 = scmp.lt.s32.totalorder (!%p142_p9), %s528_s30, 31 }
   0xf   : > { %s527_s19 = sshll.u32 (!%p142_p9), %s162_s10, 8  ;;  %s553_s24 = sshll.u32 (!%p142_p9), %s707_s16, 12 }
  0x10   : > { %s796_s20 = scalar_lea.vmem (!%p142_p9), [#allocation2], %s527_s19  ;;  %s859_s28 = scalar_lea.hbm (!%p142_p9), %s914_s3, %s553_s24 }
  0x11   : > { %s461_s25 = sshll.u32 (!%p142_p9), %s796_s20, 4  ;;  %s871_s16 = scalar_lea.sflag (!%p142_p9), [#allocation3], %s162_s10  ;;  %s861_s25 = int_to_ptr.vmem [resolvable:$true] %s461_s25 }
  0x12   : > { %s600_s29 = scalar_lea.vmem (!%p142_p9), %s861_s25, 4096 }
  0x13   : > { %v191_v0 = vld [vmem:[%s912_s1 + $0x18] sm:$0xff]  ;;  %v190_v1 = vld [vmem:[%s912_s1 + $0x10] sm:$0xff]  ;;  %v189_v2 = vld [vmem:[%s912_s1 + $0x8] sm:$0xff]  ;;  %s922_s30 = smov (!%p166_p10, %s528_s30), 31  ;;  %v662_v4 = vmov 0.0   ;;  %vm204_vm0 = vcmask 130048   ;;  %v194_v21 = vlaneseq  ;;  %p601_p11 = scmp.ne.s32.totalorder %s861_s25, %s600_s29 }
  0x14   : > { %281 = vmatprep.subr.mxu0 %v191_v0  ;;  %554 = vmatprep.subr.mxu1 %v191_v0  ;;  %v188_v3 = vld [vmem:[%s912_s1] sm:$0xff]  ;;  %s529_s6 = sshll.u32 %s922_s30, 3  ;;  %s663_s30 = smov [#allocation2]  }
  0x15   : > { %282 = vmatpush1.msra.mxu0 %v190_v1  ;;  %556 = vmatpush1.msra.mxu1 %v190_v1  ;;  %s750_s9 = scalar_lea.vmem %s911_s0, %s529_s6  ;;  %v195_v22 = vshrl.u32 %v194_v21, 7  ;;  %v192_v24 = vld [vmem:[%s913_s2] sm:$0x3]  ;;  %p602_p12 = pnand %p601_p11, %p724_p5 }
  0x16   : > { %283 = vmatprep.subr.mxu0 %v189_v2  ;;  %555 = vmatprep.subr.mxu1 %v189_v2  ;;  %v172_v5 = vld [vmem:[%s750_s9] sm:$0xff]  ;;  %v173_v7 = vld [vmem:[%s750_s9 + $0x8] sm:$0xff]  ;;  %v174_v9 = vld [vmem:[%s750_s9 + $0x10] sm:$0xff]  ;;  %s604_s4 = sshll.u32 %s663_s30, 4  ;;  %s605_s4 = int_to_ptr.vmem [resolvable:$false] %s604_s4 }
  0x17   : > { %284 = vmatpush1.msra.mxu0 %v188_v3  ;;  %557 = vmatpush1.msra.mxu1 %v188_v3  ;;  %v180_v6 = vld [vmem:[%s750_s9 + $0x40] sm:$0xff]  ;;  %v181_v8 = vld [vmem:[%s750_s9 + $0x48] sm:$0xff]  ;;  %v182_v10 = vld [vmem:[%s750_s9 + $0x50] sm:$0xff]  ;;  %v196_v23 = vsub.s32 0, %v195_v22  ;;  %v200_v25 = vsub.s32 1, %v195_v22  ;;  %p603_p13 = pneg %p602_p12  ;;  %s606_s5 = scalar_lea.vmem %s605_s4, 8192 }
  0x18   : > { %317 = vmatprep.mubr.f32.mxu0 %v662_v4  ;;  %365 = vmatprep.mubr.f32.mxu1 %v662_v4  ;;  %v175_v11 = vld [vmem:[%s750_s9 + $0x18] sm:$0xff]  ;;  %v176_v13 = vld [vmem:[%s750_s9 + $0x20] sm:$0xff]  ;;  %v177_v15 = vld [vmem:[%s750_s9 + $0x28] sm:$0xff]  ;;  %p607_p0 = scmp.lt.s32.totalorder %s861_s25, %s605_s4  ;;  %p608_p1 = scmp.lt.s32.totalorder %s606_s5, %s600_s29 }
  0x19   : > { %530 = vmatmul.mubr.msk.f32.vlgmr.msra.gmra.mxu0 %vm204_vm0, %v172_v5  ;;  %538 = vmatmul.mubr.msk.f32.vlgmr.msra.gmra.mxu1 %vm204_vm0, %v180_v6  ;;  %v183_v12 = vld [vmem:[%s750_s9 + $0x58] sm:$0xff]  ;;  %v184_v14 = vld [vmem:[%s750_s9 + $0x60] sm:$0xff]  ;;  %v185_v16 = vld [vmem:[%s750_s9 + $0x68] sm:$0xff]  ;;  %v790_v26 = vrot.slane %v192_v24, %v196_v23  ;;  %v792_v27 = vrot.slane %v192_v24, %v200_v25 }
  0x1a   : > { %323 = vmatprep.mubr.f32.mxu0 %v662_v4  ;;  %371 = vmatprep.mubr.f32.mxu1 %v662_v4  ;;  %v178_v17 = vld [vmem:[%s750_s9 + $0x30] sm:$0xff]  ;;  %v179_v19 = vld [vmem:[%s750_s9 + $0x38] sm:$0xff]  ;;  %p609_p2 = por %p608_p1, %p607_p0 }
  0x1b   : > { %v186_v18 = vld [vmem:[%s750_s9 + $0x70] sm:$0xff]  ;;  %v187_v20 = vld [vmem:[%s750_s9 + $0x78] sm:$0xff] }
  0x1c   : > { %p610_p3 = pnand %p609_p2, %p603_p13 }
  0x1d   : > { %531 = vmatmul.mubr.msk.f32.gmra.mxu0 %vm204_vm0, %v173_v7  ;;  %539 = vmatmul.mubr.msk.f32.gmra.mxu1 %vm204_vm0, %v181_v8 }
  0x1e   : > { %329 = vmatprep.mubr.f32.mxu0 %v662_v4  ;;  %377 = vmatprep.mubr.f32.mxu1 %v662_v4 }
  0x21   : > { %532 = vmatmul.mubr.msk.f32.gmra.mxu0 %vm204_vm0, %v174_v9  ;;  %540 = vmatmul.mubr.msk.f32.gmra.mxu1 %vm204_vm0, %v182_v10 }
  0x22   : > { %335 = vmatprep.mubr.f32.mxu0 %v662_v4  ;;  %383 = vmatprep.mubr.f32.mxu1 %v662_v4 }
  0x25   : > { %533 = vmatmul.mubr.msk.f32.gmra.mxu0 %vm204_vm0, %v175_v11  ;;  %541 = vmatmul.mubr.msk.f32.gmra.mxu1 %vm204_vm0, %v183_v12 }
  0x26   : > { %341 = vmatprep.mubr.f32.mxu0 %v662_v4  ;;  %389 = vmatprep.mubr.f32.mxu1 %v662_v4 }
  0x29   : > { %534 = vmatmul.mubr.msk.f32.gmra.mxu0 %vm204_vm0, %v176_v13  ;;  %542 = vmatmul.mubr.msk.f32.gmra.mxu1 %vm204_vm0, %v184_v14 }
  0x2a   : > { %347 = vmatprep.mubr.f32.mxu0 %v662_v4  ;;  %395 = vmatprep.mubr.f32.mxu1 %v662_v4 }
  0x2d   : > { %535 = vmatmul.mubr.msk.f32.gmra.mxu0 %vm204_vm0, %v177_v15  ;;  %543 = vmatmul.mubr.msk.f32.gmra.mxu1 %vm204_vm0, %v185_v16 }
  0x2e   : > { %353 = vmatprep.mubr.f32.mxu0 %v662_v4  ;;  %401 = vmatprep.mubr.f32.mxu1 %v662_v4 }
  0x31   : > { %536 = vmatmul.mubr.msk.f32.gmra.mxu0 %vm204_vm0, %v178_v17  ;;  %544 = vmatmul.mubr.msk.f32.gmra.mxu1 %vm204_vm0, %v186_v18 }
  0x32   : > { %359 = vmatprep.mubr.f32.mxu0 %v662_v4  ;;  %407 = vmatprep.mubr.f32.mxu1 %v662_v4 }
  0x35   : > { %537 = vmatmul.mubr.msk.f32.gmra.mxu0 %vm204_vm0, %v179_v19  ;;  %545 = vmatmul.mubr.msk.f32.gmra.mxu1 %vm204_vm0, %v187_v20 }
  0xd9   : > { %v319_v28 = vpop.f32.mrf.mxu0  ;;  %v367_v29 = vpop.f32.mrf.mxu1 }
  0xda   : > { %v320_v30 = vadd.f32 %v319_v28, %v790_v26  ;;  %v368_v31 = vadd.f32 %v367_v29, %v790_v26 }
  0xdb   : > { %v321_v32 = vpop.f32.mrf.mxu0  ;;  %v369_v33 = vpop.f32.mrf.mxu1 }
  0xdc   : > { %414 = vst [vmem:[%s796_s20] sm:$0xff] %v320_v30  ;;  %430 = vst [vmem:[%s796_s20 + $0x80] sm:$0xff] %v368_v31  ;;  %v322_v34 = vadd.f32 %v321_v32, %v792_v27  ;;  %v370_v35 = vadd.f32 %v369_v33, %v792_v27 }
  0xdd   : > { %v325_v36 = vpop.f32.mrf.mxu0  ;;  %v373_v37 = vpop.f32.mrf.mxu1 }
  0xde   : > { %415 = vst [vmem:[%s796_s20 + $0x8] sm:$0xff] %v322_v34  ;;  %431 = vst [vmem:[%s796_s20 + $0x88] sm:$0xff] %v370_v35  ;;  %v326_v38 = vadd.f32 %v325_v36, %v790_v26  ;;  %v374_v39 = vadd.f32 %v373_v37, %v790_v26 }
  0xdf   : > { %v327_v40 = vpop.f32.mrf.mxu0  ;;  %v375_v41 = vpop.f32.mrf.mxu1 }
  0xe0   : > { %416 = vst [vmem:[%s796_s20 + $0x10] sm:$0xff] %v326_v38  ;;  %432 = vst [vmem:[%s796_s20 + $0x90] sm:$0xff] %v374_v39  ;;  %v328_v42 = vadd.f32 %v327_v40, %v792_v27  ;;  %v376_v43 = vadd.f32 %v375_v41, %v792_v27 }
  0xe1   : > { %v331_v44 = vpop.f32.mrf.mxu0  ;;  %v379_v45 = vpop.f32.mrf.mxu1 }
  0xe2   : > { %417 = vst [vmem:[%s796_s20 + $0x18] sm:$0xff] %v328_v42  ;;  %433 = vst [vmem:[%s796_s20 + $0x98] sm:$0xff] %v376_v43  ;;  %v332_v46 = vadd.f32 %v331_v44, %v790_v26  ;;  %v380_v47 = vadd.f32 %v379_v45, %v790_v26 }
  0xe3   : > { %v333_v48 = vpop.f32.mrf.mxu0  ;;  %v381_v49 = vpop.f32.mrf.mxu1 }
  0xe4   : > { %418 = vst [vmem:[%s796_s20 + $0x20] sm:$0xff] %v332_v46  ;;  %434 = vst [vmem:[%s796_s20 + $0xa0] sm:$0xff] %v380_v47  ;;  %v334_v50 = vadd.f32 %v333_v48, %v792_v27  ;;  %v382_v51 = vadd.f32 %v381_v49, %v792_v27 }
  0xe5   : > { %v337_v52 = vpop.f32.mrf.mxu0  ;;  %v385_v53 = vpop.f32.mrf.mxu1 }
  0xe6   : > { %419 = vst [vmem:[%s796_s20 + $0x28] sm:$0xff] %v334_v50  ;;  %435 = vst [vmem:[%s796_s20 + $0xa8] sm:$0xff] %v382_v51  ;;  %v338_v54 = vadd.f32 %v337_v52, %v790_v26  ;;  %v386_v55 = vadd.f32 %v385_v53, %v790_v26 }
  0xe7   : > { %v339_v56 = vpop.f32.mrf.mxu0  ;;  %v387_v57 = vpop.f32.mrf.mxu1 }
  0xe8   : > { %420 = vst [vmem:[%s796_s20 + $0x30] sm:$0xff] %v338_v54  ;;  %436 = vst [vmem:[%s796_s20 + $0xb0] sm:$0xff] %v386_v55  ;;  %v340_v58 = vadd.f32 %v339_v56, %v792_v27  ;;  %v388_v59 = vadd.f32 %v387_v57, %v792_v27 }
  0xe9   : > { %v343_v60 = vpop.f32.mrf.mxu0  ;;  %v391_v61 = vpop.f32.mrf.mxu1 }
  0xea   : > { %421 = vst [vmem:[%s796_s20 + $0x38] sm:$0xff] %v340_v58  ;;  %437 = vst [vmem:[%s796_s20 + $0xb8] sm:$0xff] %v388_v59  ;;  %v344_v62 = vadd.f32 %v343_v60, %v790_v26  ;;  %v392_v63 = vadd.f32 %v391_v61, %v790_v26 }
  0xeb   : > { %v345_v0 = vpop.f32.mrf.mxu0  ;;  %v393_v1 = vpop.f32.mrf.mxu1 }
  0xec   : > { %422 = vst [vmem:[%s796_s20 + $0x40] sm:$0xff] %v344_v62  ;;  %438 = vst [vmem:[%s796_s20 + $0xc0] sm:$0xff] %v392_v63  ;;  %v346_v2 = vadd.f32 %v345_v0, %v792_v27  ;;  %v394_v3 = vadd.f32 %v393_v1, %v792_v27 }
  0xed   : > { %v349_v4 = vpop.f32.mrf.mxu0  ;;  %v397_v5 = vpop.f32.mrf.mxu1 }
  0xee   : > { %423 = vst [vmem:[%s796_s20 + $0x48] sm:$0xff] %v346_v2  ;;  %439 = vst [vmem:[%s796_s20 + $0xc8] sm:$0xff] %v394_v3  ;;  %v350_v6 = vadd.f32 %v349_v4, %v790_v26  ;;  %v398_v7 = vadd.f32 %v397_v5, %v790_v26 }
  0xef   : > { %v351_v8 = vpop.f32.mrf.mxu0  ;;  %v399_v9 = vpop.f32.mrf.mxu1 }
  0xf0   : > { %424 = vst [vmem:[%s796_s20 + $0x50] sm:$0xff] %v350_v6  ;;  %440 = vst [vmem:[%s796_s20 + $0xd0] sm:$0xff] %v398_v7  ;;  %v352_v10 = vadd.f32 %v351_v8, %v792_v27  ;;  %v400_v11 = vadd.f32 %v399_v9, %v792_v27 }
  0xf1   : > { %v355_v12 = vpop.f32.mrf.mxu0  ;;  %v403_v13 = vpop.f32.mrf.mxu1 }
  0xf2   : > { %425 = vst [vmem:[%s796_s20 + $0x58] sm:$0xff] %v352_v10  ;;  %441 = vst [vmem:[%s796_s20 + $0xd8] sm:$0xff] %v400_v11  ;;  %v356_v14 = vadd.f32 %v355_v12, %v790_v26  ;;  %v404_v15 = vadd.f32 %v403_v13, %v790_v26 }
  0xf3   : > { %v357_v16 = vpop.f32.mrf.mxu0  ;;  %v405_v17 = vpop.f32.mrf.mxu1 }
  0xf4   : > { %426 = vst [vmem:[%s796_s20 + $0x60] sm:$0xff] %v356_v14  ;;  %442 = vst [vmem:[%s796_s20 + $0xe0] sm:$0xff] %v404_v15  ;;  %v358_v18 = vadd.f32 %v357_v16, %v792_v27  ;;  %v406_v19 = vadd.f32 %v405_v17, %v792_v27 }
  0xf5   : > { %v361_v20 = vpop.f32.mrf.mxu0  ;;  %v409_v21 = vpop.f32.mrf.mxu1 }
  0xf6   : > { %427 = vst [vmem:[%s796_s20 + $0x68] sm:$0xff] %v358_v18  ;;  %443 = vst [vmem:[%s796_s20 + $0xe8] sm:$0xff] %v406_v19  ;;  %v362_v22 = vadd.f32 %v361_v20, %v790_v26  ;;  %v410_v23 = vadd.f32 %v409_v21, %v790_v26 }
  0xf7   : > { %v363_v24 = vpop.f32.mrf.mxu0  ;;  %v411_v25 = vpop.f32.mrf.mxu1 }
  0xf8   : > { %428 = vst [vmem:[%s796_s20 + $0x70] sm:$0xff] %v362_v22  ;;  %444 = vst [vmem:[%s796_s20 + $0xf0] sm:$0xff] %v410_v23  ;;  %v364_v28 = vadd.f32 %v363_v24, %v792_v27  ;;  %v412_v29 = vadd.f32 %v411_v25, %v792_v27 }
  0xfa   : > { %429 = vst [vmem:[%s796_s20 + $0x78] sm:$0xff] %v364_v28  ;;  %445 = vst [vmem:[%s796_s20 + $0xf8] sm:$0xff] %v412_v29 }
  0xfb   : > { %613 = shalt.err (!%p610_p3)
}
  0xfc   : > { %s614_s6 = scalar_lea.hbm %s859_s28, 4096  ;;  %s618_s9 = scalar_lea.hbm %s914_s3, 8192 }
  0xfd   : > { %p615_p4 = scmp.ne.s32.totalorder %s859_s28, %s614_s6  ;;  %p619_p9 = scmp.lt.s32.totalorder %s859_s28, %s914_s3 }
  0xfe   : > { %p620_p10 = scmp.lt.s32.totalorder %s618_s9, %s614_s6 }
  0xff   : > { %p616_p7 = pnand %p615_p4, %p724_p5 }
 0x100   : > { %p621_p11 = por %p620_p10, %p619_p9 }
 0x101   : > { %p617_p8 = pneg %p616_p7 }
 0x103   : > { %p622_p12 = pnand %p621_p11, %p617_p8 }
 0x105   : > { %625 = shalt.err (!%p622_p12)
}
 0x106   : > { %s664_s17 = smov 256   ;;  %s665_s19 = smov 16  }
 0x107   : > { %558 = dma.vmem_to_hbm [thread:$0]  (%p724_p5), %s861_s25, 4096, %s859_s28, %s871_s16, %s664_s17, %s664_s17, %s665_s19  }
 0x108 PF: > { %p564_p13 = scmp.ge.s32.totalorder %s660_s15, 2  ;;  %s476_s20 = sand.u32 1, %s648_s12  }
 0x109   : > { %s477_s24 = scalar_lea.sflag [#allocation3], %s476_s20 }
 0x10a   : > { %p561_p0 = pnand %p564_p13, %p728_p6 }
 0x10c   : > { %p562_p1 = pneg %p561_p0 }
 0x10e   : > { %643 = dma.done.wait (%p562_p1), %s477_s24, 4096  }
 0x10f   : > { %645 = vsyncadd (%p562_p1), %s477_s24, 4294963200  ;;  %p13_p2 = scmp.ge.s32.totalorder %s711_s18, 4   ;;  %s917_s12 = smov %s652_s13 }
 0x110   : > { %s918_s13 = smov %s656_s14  ;;  %s919_s14 = smov %s722_s21 }
 0x111   : > { %s920_s15 = smov %s711_s18  ;;  %15 = sbr.rel (!%p13_p2) target bundleno = 3 (0x3), region = 67 }
 0x116   :  { %482 = vsyncpa [#allocation3], 1 }
 0x117   :  { %484 = vsyncpa [#allocation3 + $0x1], 1 }

</bundles_post_ra>
